<compile_context>
chip_gen: v7x
topology: tpu7x:2x2x1
jax: 0.10.0
libtpu: 0.0.40
codegen_flags: <defaults>
</compile_context>

<pallas_src>
import functools

import jax
import jax.numpy as jnp
from jax.experimental import pallas as pl
from jax.experimental.pallas import tpu as pltpu

LANE = 128
_LN2 = 0.6931471805599453


def _logcosh_kernel(y_ref, yp_ref, out_ref, acc_ref, *, n_elem, tile_rows):
    c = pl.program_id(0)          # chunk (parallel axis)
    s = pl.program_id(1)          # step within chunk (reduction axis)
    n_steps = pl.num_programs(1)

    @pl.when(s == 0)
    def _():
        acc_ref[...] = jnp.zeros_like(acc_ref)

    ey = (y_ref[...].astype(jnp.float32)
          - yp_ref[...].astype(jnp.float32)) + jnp.float32(1e-12)
    ax = jnp.abs(ey)
    # stable log(cosh(x)) = |x| + log1p(exp(-2|x|)) - log(2)
    val = ax + jnp.log1p(jnp.exp(jnp.float32(-2.0) * ax)) - jnp.float32(_LN2)

    # mask off padded tail elements (global flattened index >= n_elem)
    # NOTE: int32 indexing limits this to < 2^31 elements, plenty here.
    base = (c * n_steps + s) * (tile_rows * LANE)
    row_idx = jax.lax.broadcasted_iota(jnp.int32, (tile_rows, LANE), 0)
    col_idx = jax.lax.broadcasted_iota(jnp.int32, (tile_rows, LANE), 1)
    gidx = base + row_idx * LANE + col_idx
    val = jnp.where(gidx < n_elem, val, jnp.float32(0.0))

    # fold the tile into the (8, 128) accumulator with VPU adds only
    acc_ref[...] += val.reshape(tile_rows // 8, 8, LANE).sum(axis=0)

    # once per chunk: reduce sublanes and emit a lane-dense (1, 128) partial
    @pl.when(s == n_steps - 1)
    def _():
        out_ref[...] = jnp.sum(acc_ref[...], axis=0, keepdims=True)


def logcosh_loss(y_t, y_prime_t, *, tile_rows=1024, num_chunks=2):
    assert y_t.shape == y_prime_t.shape
    n_elem = int(y_t.size)

    itemsize = jnp.dtype(y_t.dtype).itemsize
    # sublane multiple required by the dtype's packed layout: 8/16/32
    min_sub = 8 * max(1, 4 // max(1, itemsize))

    flat_y = y_t.reshape(-1)
    flat_yp = y_prime_t.reshape(-1)

    rows = -(-n_elem // LANE)                         # ceil(n / 128)
    # effective tile: big for big inputs, one tight tile for tiny ones
    t = min(tile_rows, -(-rows // min_sub) * min_sub)
    t = -(-t // min_sub) * min_sub                    # round to sublane multiple
    total_tiles = -(-rows // t)
    chunks = max(1, min(num_chunks, total_tiles))
    steps = -(-total_tiles // chunks)
    rows_p = chunks * steps * t

    pad = rows_p * LANE - n_elem
    if pad:
        flat_y = jnp.pad(flat_y, (0, pad))
        flat_yp = jnp.pad(flat_yp, (0, pad))
    y2 = flat_y.reshape(rows_p, LANE)
    yp2 = flat_yp.reshape(rows_p, LANE)

    kernel = functools.partial(_logcosh_kernel, n_elem=n_elem, tile_rows=t)

    partials = pl.pallas_call(
        kernel,
        out_shape=jax.ShapeDtypeStruct((chunks, LANE), jnp.float32),
        grid_spec=pltpu.PrefetchScalarGridSpec(
            num_scalar_prefetch=0,
            grid=(chunks, steps),
            in_specs=[
                pl.BlockSpec((t, LANE), lambda c, s: (c * steps + s, 0)),
                pl.BlockSpec((t, LANE), lambda c, s: (c * steps + s, 0)),
            ],
            out_specs=pl.BlockSpec((1, LANE), lambda c, s: (c, 0)),
            scratch_shapes=[pltpu.VMEM((8, LANE), jnp.float32)],
        ),
        compiler_params=pltpu.CompilerParams(
            dimension_semantics=("parallel", "arbitrary"),
        ),
    )(y2, yp2)

    return jnp.sum(partials) / jnp.float32(n_elem)


if __name__ == "__main__":
    key = jax.random.PRNGKey(0)
    k1, k2 = jax.random.split(key)
    shape = (2, 4, 16, 16)  # NCHW-like synthetic inputs
    y_t = jax.random.normal(k1, shape, dtype=jnp.float32)
    y_prime_t = jax.random.normal(k2, shape, dtype=jnp.float32)

    loss = logcosh_loss(y_t, y_prime_t)
    jax.block_until_ready(loss)

    # reference check in plain JAX
    ref = jnp.mean(jnp.log(jnp.cosh((y_t - y_prime_t) + 1e-12)))
    assert jnp.allclose(loss, ref, rtol=1e-5, atol=1e-6), (loss, ref)

    print("KERNEL_OK")
</pallas_src>

<mosaic_0001>
module attributes {stable_mosaic.version = 11 : i64} {
  func.func @_logcosh_kernel(%arg0: i32, %arg1: i32, %arg2: memref<16x128xf32, #tpu.memory_space<vmem>>, %arg3: memref<16x128xf32, #tpu.memory_space<vmem>>, %arg4: memref<1x128xf32, #tpu.memory_space<vmem>>, %arg5: memref<8x128xf32, #tpu.memory_space<vmem>>) attributes {dimension_semantics = [#tpu.dimension_semantics<parallel>, #tpu.dimension_semantics<arbitrary>], iteration_bounds = array<i64: 1, 1>, scalar_prefetch = 0 : i64, scratch_operands = 1 : i64, tpu.core_type = #tpu.core_type<tc>, window_params = [{transform_indices = @transform_0, window_bounds = array<i64: 16, 128>}, {transform_indices = @transform_1, window_bounds = array<i64: 16, 128>}, {transform_indices = @transform_2, window_bounds = array<i64: 1, 128>}]} {
    %c0_i32 = arith.constant 0 : i32
    %0 = arith.cmpi eq, %arg1, %c0_i32 : i32
    %1 = arith.extui %0 : i1 to i32
    %c0_i32_0 = arith.constant 0 : i32
    %2 = arith.cmpi ne, %1, %c0_i32_0 : i32
    scf.if %2 {
      %cst_15 = arith.constant 0.000000e+00 : f32
      %38 = vector.broadcast %cst_15 : f32 to vector<8x128xf32>
      %c0_16 = arith.constant 0 : index
      %c0_17 = arith.constant 0 : index
      %39 = vector.load %arg5[%c0_16, %c0_17] : memref<8x128xf32, #tpu.memory_space<vmem>>, vector<8x128xf32>
      tpu.vector_store %arg5[%c0_16, %c0_17], %38 {strides = array<i32>} : memref<8x128xf32, #tpu.memory_space<vmem>>, vector<8x128xf32>,
    } else {
    }
    %c0 = arith.constant 0 : index
    %c0_1 = arith.constant 0 : index
    %3 = vector.load %arg2[%c0, %c0_1] : memref<16x128xf32, #tpu.memory_space<vmem>>, vector<16x128xf32>
    %c0_2 = arith.constant 0 : index
    %c0_3 = arith.constant 0 : index
    %4 = vector.load %arg3[%c0_2, %c0_3] : memref<16x128xf32, #tpu.memory_space<vmem>>, vector<16x128xf32>
    %5 = arith.subf %3, %4 : vector<16x128xf32>
    %cst = arith.constant 9.99999996E-13 : f32
    %6 = vector.broadcast %cst : f32 to vector<16x128xf32>
    %7 = arith.addf %5, %6 : vector<16x128xf32>
    %8 = math.absf %7 : vector<16x128xf32>
    %cst_4 = arith.constant -2.000000e+00 : f32
    %9 = vector.broadcast %cst_4 : f32 to vector<16x128xf32>
    %10 = arith.mulf %9, %8 : vector<16x128xf32>
    %11 = math.exp %10 : vector<16x128xf32>
    %12 = math.log1p %11 : vector<16x128xf32>
    %13 = arith.addf %8, %12 : vector<16x128xf32>
    %cst_5 = arith.constant 0.693147182 : f32
    %14 = vector.broadcast %cst_5 : f32 to vector<16x128xf32>
    %15 = arith.subf %13, %14 : vector<16x128xf32>
    %c1_i32 = arith.constant 1 : i32
    %16 = arith.muli %arg0, %c1_i32 : i32
    %17 = arith.addi %16, %arg1 : i32
    %c2048_i32 = arith.constant 2048 : i32
    %18 = arith.muli %17, %c2048_i32 : i32
    %19 = tpu.iota {dimensions = array<i32: 0>} : vector<16x128xi32>
    %20 = tpu.iota {dimensions = array<i32: 1>} : vector<16x128xi32>
    %c128_i32 = arith.constant 128 : i32
    %21 = vector.broadcast %c128_i32 : i32 to vector<16x128xi32>
    %22 = arith.muli %19, %21 : vector<16x128xi32>
    %23 = vector.broadcast %18 : i32 to vector<16x128xi32>
    %24 = arith.addi %23, %22 : vector<16x128xi32>
    %25 = arith.addi %24, %20 : vector<16x128xi32>
    %c2048_i32_6 = arith.constant 2048 : i32
    %26 = vector.broadcast %c2048_i32_6 : i32 to vector<16x128xi32>
    %27 = arith.cmpi slt, %25, %26 : vector<16x128xi32>
    %cst_7 = arith.constant 0.000000e+00 : f32
    %28 = vector.broadcast %cst_7 : f32 to vector<16x128xf32>
    %29 = arith.select %27, %15, %28 : vector<16x128xi1>, vector<16x128xf32>
    %c0_8 = arith.constant 0 : index
    %c0_9 = arith.constant 0 : index
    %30 = vector.load %arg5[%c0_8, %c0_9] : memref<8x128xf32, #tpu.memory_space<vmem>>, vector<8x128xf32>
    %31 = vector.shape_cast %29 : vector<16x128xf32> to vector<2x8x128xf32>
    %cst_10 = arith.constant dense<0.000000e+00> : vector<8x128xf32>
    %32 = vector.multi_reduction <add>, %31, %cst_10 [0] : vector<2x8x128xf32> to vector<8x128xf32>
    %33 = arith.addf %30, %32 : vector<8x128xf32>
    %c0_11 = arith.constant 0 : index
    %c0_12 = arith.constant 0 : index
    %34 = vector.load %arg5[%c0_11, %c0_12] : memref<8x128xf32, #tpu.memory_space<vmem>>, vector<8x128xf32>
    tpu.vector_store %arg5[%c0_11, %c0_12], %33 {strides = array<i32>} : memref<8x128xf32, #tpu.memory_space<vmem>>, vector<8x128xf32>,
    %c0_i32_13 = arith.constant 0 : i32
    %35 = arith.cmpi eq, %arg1, %c0_i32_13 : i32
    %36 = arith.extui %35 : i1 to i32
    %c0_i32_14 = arith.constant 0 : i32
    %37 = arith.cmpi ne, %36, %c0_i32_14 : i32
    scf.if %37 {
      %c0_15 = arith.constant 0 : index
      %c0_16 = arith.constant 0 : index
      %38 = vector.load %arg5[%c0_15, %c0_16] : memref<8x128xf32, #tpu.memory_space<vmem>>, vector<8x128xf32>
      %cst_17 = arith.constant dense<0.000000e+00> : vector<128xf32>
      %39 = vector.multi_reduction <add>, %38, %cst_17 [0] : vector<8x128xf32> to vector<128xf32>
      %40 = vector.shape_cast %39 : vector<128xf32> to vector<1x128xf32>
      %c0_18 = arith.constant 0 : index
      %c0_19 = arith.constant 0 : index
      %41 = vector.load %arg4[%c0_18, %c0_19] : memref<1x128xf32, #tpu.memory_space<vmem>>, vector<1x128xf32>
      tpu.vector_store %arg4[%c0_18, %c0_19], %40 {strides = array<i32>} : memref<1x128xf32, #tpu.memory_space<vmem>>, vector<1x128xf32>,
    } else {
    }
    return
  }
  func.func @transform_0(%arg0: i32, %arg1: i32) -> (i32, i32) {
    %c1_i32 = arith.constant 1 : i32
    %0 = arith.muli %arg0, %c1_i32 : i32
    %1 = arith.addi %0, %arg1 : i32
    %c0_i32 = arith.constant 0 : i32
    %c0_i32_0 = arith.constant 0 : i32
    return %1, %c0_i32 : i32, i32
  }
  func.func @transform_1(%arg0: i32, %arg1: i32) -> (i32, i32) {
    %c1_i32 = arith.constant 1 : i32
    %0 = arith.muli %arg0, %c1_i32 : i32
    %1 = arith.addi %0, %arg1 : i32
    %c0_i32 = arith.constant 0 : i32
    %c0_i32_0 = arith.constant 0 : i32
    return %1, %c0_i32 : i32, i32
  }
  func.func @transform_2(%arg0: i32, %arg1: i32) -> (i32, i32) {
    %c0_i32 = arith.constant 0 : i32
    %c0_i32_0 = arith.constant 0 : i32
    return %arg0, %c0_i32 : i32, i32
  }
}

</mosaic_0001>

<bundles_post_ra>
// kernel: tpu_custom_call.1
= control target key start
LH: loop header
LB: loop body
LE: loop exit
PB: predicated region body
PF: predicated region fallthrough
CT: control target
= control target key end

     0   :  { %7 = vsyncpa [#allocation4], 0  ;;  %s287_s0 = inlined_call_operand.hbm [shape: f32[16,128], index: 0, kind: input, shape index: {}]   ;;  %s288_s1 = inlined_call_operand.hbm [shape: f32[16,128], index: 1, kind: input, shape index: {}]   ;;  %s289_s2 = inlined_call_operand.hbm [shape: f32[1,128], index: 2, kind: output, shape index: {}]  }
   0x1   :  { %8 = vsyncpa [#allocation7], 0 }
   0x2   :  { %9 = vsyncpa [#allocation5], 0  ;;  %s231_s9 = smov [#allocation3]   ;;  %s159_s13 = scalar_lea.hbm %s287_s0, 256 }
   0x3   :  { %s19_s10 = sshll.u32 %s231_s9, 4  ;;  %p160_p0 = scmp.ne.s32.totalorder %s287_s0, %s159_s13  ;;  %s20_s10 = int_to_ptr.vmem [resolvable:$true] %s19_s10 }
   0x4   :  { %p163_p1 = scmp.lt.u32.totalorder %s159_s13, %s287_s0 }
   0x6   :  { %p165_p2 = pnand %p163_p1, %p160_p0 }
   0x8   :  { %168 = shalt.err (!%p165_p2)
}
   0x9   :  { %s169_s18 = scalar_lea.vmem %s20_s10, 256  ;;  %p174_p4 = scmp.lt.s32.totalorder %s20_s10, %s20_s10 }
   0xa   :  { %p170_p3 = scmp.ne.s32.totalorder %s20_s10, %s169_s18  ;;  %p175_p5 = scmp.lt.s32.totalorder %s169_s18, %s169_s18 }
   0xc   :  { %p176_p6 = por %p175_p5, %p174_p4 }
   0xe   :  { %p177_p7 = pnand %p176_p6, %p170_p3 }
  0x10   :  { %180 = shalt.err (!%p177_p7)
}
  0x11   :  { %s232_s19 = smov 128   ;;  %s233_s20 = smov 8  }
  0x12   :  { %25 = dma.hbm_to_vmem [thread:$0]  %s287_s0, 256, %s20_s10, [#allocation4], %s232_s19, %s232_s19, %s233_s20  }
  0x13   :  { %s234_s23 = smov [#allocation6]   ;;  %s181_s27 = scalar_lea.hbm %s288_s1, 256 }
  0x14   :  { %s35_s24 = sshll.u32 %s234_s23, 4  ;;  %p182_p8 = scmp.ne.s32.totalorder %s288_s1, %s181_s27  ;;  %s36_s24 = int_to_ptr.vmem [resolvable:$true] %s35_s24 }
  0x15   :  { %p185_p9 = scmp.lt.u32.totalorder %s181_s27, %s288_s1 }
  0x17   :  { %p187_p10 = pnand %p185_p9, %p182_p8 }
  0x19   :  { %190 = shalt.err (!%p187_p10)
}
  0x1a   :  { %s191_s4 = scalar_lea.vmem %s36_s24, 256  ;;  %p196_p12 = scmp.lt.s32.totalorder %s36_s24, %s36_s24 }
  0x1b   :  { %p192_p11 = scmp.ne.s32.totalorder %s36_s24, %s191_s4  ;;  %p197_p13 = scmp.lt.s32.totalorder %s191_s4, %s191_s4 }
  0x1d   :  { %p198_p0 = por %p197_p13, %p196_p12 }
  0x1f   :  { %p199_p1 = pnand %p198_p0, %p192_p11 }
  0x21   :  { %202 = shalt.err (!%p199_p1)
}
  0x22   :  { %41 = dma.hbm_to_vmem [thread:$0]  %s288_s1, 256, %s36_s24, [#allocation7], %s232_s19, %s232_s19, %s233_s20  }
  0x23   :  { %225 = dma.done.wait [#allocation4], 256  }
  0x24   :  { %226 = vsyncadd [#allocation4], 4294967040 }
  0x25   :  { %227 = dma.done.wait [#allocation7], 256  }
  0x26   :  { %228 = vsyncadd [#allocation7], 4294967040  ;;  %v57_v0 = vld [vmem:[#allocation3] sm:$0xff]  ;;  %v58_v1 = vld [vmem:[#allocation3 + $0x8] sm:$0xff]  ;;  %v97_v14 = vlaneseq  ;;  %s235_s1 = smov [#allocation8]  }
  0x27   :  { %v59_v2 = vld [vmem:[#allocation6] sm:$0xff]  ;;  %v60_v3 = vld [vmem:[#allocation6 + $0x8] sm:$0xff]  ;;  %s134_s6 = sshll.u32 %s235_s1, 4  ;;  %s135_s6 = int_to_ptr.vmem [resolvable:$true] %s134_s6 }
  0x28   :  { %v61_v4 = vsub.f32 %v57_v0, %v59_v2  ;;  %v62_v5 = vsub.f32 %v58_v1, %v60_v3  ;;  %v98_v19 = vshrl.u32 %v97_v14, 7  ;;  %v101_v27 = vand.u32 127, %v97_v14  ;;  %s203_s7 = scalar_lea.vmem %s135_s6, 16  ;;  %s207_s8 = scalar_lea.vmem %s135_s6, 32 }
  0x29   :  { %p204_p2 = scmp.ne.s32.totalorder %s135_s6, %s203_s7  ;;  %p208_p3 = scmp.lt.s32.totalorder %s135_s6, %s135_s6 }
  0x2a   :  { %v63_v6 = vadd.f32 1e-12, %v61_v4  ;;  %v64_v7 = vadd.f32 1e-12, %v62_v5  ;;  %v99_v22 = vadd.s32 8, %v98_v19  ;;  %v102_v28 = vmul.u32 128, %v98_v19  ;;  %p209_p4 = scmp.lt.s32.totalorder %s207_s8, %s203_s7 }
  0x2c   :  { %v65_v8 = vand.u32 2147483647, %v63_v6  ;;  %v66_v9 = vand.u32 2147483647, %v64_v7  ;;  %v103_v29 = vmul.u32 128, %v99_v22  ;;  %v107_v35 = vadd.s32 %v102_v28, %v101_v27  ;;  %p210_p5 = por %p209_p4, %p208_p3 }
  0x2e   :  { %v67_v10 = vmul.f32 -2.0, %v65_v8  ;;  %v68_v11 = vmul.f32 -2.0, %v66_v9  ;;  %v108_v37 = vadd.s32 %v103_v29, %v101_v27  ;;  %vm109_vm2 = vcmp.lt.s32.totalorder %v107_v35, 2048  ;;  %p211_p6 = pnand %p210_p5, %p204_p2 }
  0x30   :  { %v69_v12 = vmul.f32 1.442695, %v67_v10  ;;  %v71_v13 = vmul.f32 1.442695, %v68_v11  ;;  %vm110_vm3 = vcmp.lt.s32.totalorder %v108_v37, 2048 }
  0x32   :  { %151 = vpow2.f32 %v69_v12 }
  0x33   :  { %153 = vpow2.f32 %v71_v13 }
  0x3c   :  { %v152_v15 = vpop.eup %151 }
  0x3d   :  { %v154_v16 = vpop.eup %153  ;;  %v73_v17 = vadd.f32 1.0, %v152_v15  ;;  %v76_v20 = vmul.f32 -0.5, %v152_v15  ;;  %v79_v24 = vand.u32 2147483647, %v152_v15 }
  0x3e   :  { %v82_v18 = vadd.f32 1.0, %v154_v16  ;;  %v85_v21 = vmul.f32 -0.5, %v154_v16  ;;  %v88_v26 = vand.u32 2147483647, %v154_v16 }
  0x3f   :  { %155 = vlog2.f32 %v73_v17  ;;  %v77_v23 = vadd.f32 1.0, %v76_v20  ;;  %vm80_vm0 = vcmp.lt.f32.partialorder %v79_v24, 0.0004427343 }
  0x40   :  { %157 = vlog2.f32 %v82_v18  ;;  %v86_v25 = vadd.f32 1.0, %v85_v21  ;;  %vm89_vm1 = vcmp.lt.f32.partialorder %v88_v26, 0.0004427343 }
  0x41   :  { %v78_v30 = vmul.f32 %v152_v15, %v77_v23 }
  0x42   :  { %v87_v32 = vmul.f32 %v154_v16, %v86_v25 }
  0x49   :  { %v156_v31 = vpop.eup %155 }
  0x4a   :  { %v158_v33 = vpop.eup %157  ;;  %v75_v34 = vmul.f32 0.6931472, %v156_v31 }
  0x4b   :  { %v84_v36 = vmul.f32 0.6931472, %v158_v33 }
  0x4c   :  { %v81_v38 = vsel %vm80_vm0, %v78_v30, %v75_v34 }
  0x4d   :  { %v90_v39 = vsel %vm89_vm1, %v87_v32, %v84_v36  ;;  %v91_v40 = vadd.f32 %v81_v38, %v65_v8 }
  0x4e   :  { %v92_v41 = vadd.f32 %v90_v39, %v66_v9 }
  0x4f   :  { %v144_v42 = vadd.f32 -0.6931472, %v91_v40 }
  0x50   :  { %v145_v43 = vadd.f32 -0.6931472, %v92_v41 }
  0x51   :  { %v111_v44 = vsel %vm109_vm2, %v144_v42, 0.0 }
  0x52   :  { %v112_v45 = vsel %vm110_vm3, %v145_v43, 0.0 }
  0x53   :  { %v114_v46 = vadd.f32 %v112_v45, %v111_v44 }
  0x55   :  { %v121_v47 = vrot.slane %v114_v46, 4 }
  0x57   :  { %v122_v48 = vadd.f32 %v121_v47, %v114_v46 }
  0x59   :  { %v123_v49 = vrot.slane %v122_v48, 2 }
  0x5b   :  { %v124_v50 = vadd.f32 %v123_v49, %v122_v48 }
  0x5d   :  { %v125_v51 = vrot.slane %v124_v50, 1 }
  0x5f   :  { %v126_v52 = vadd.f32 %v125_v51, %v124_v50 }
  0x61   :  { %127 = vst [vmem:[#allocation8] sm:$0x1] %v126_v52 }
  0x62   :  { %214 = shalt.err (!%p211_p6)
}
  0x63   :  { %s215_s11 = scalar_lea.hbm %s289_s2, 16 }
  0x64   :  { %p216_p7 = scmp.ne.s32.totalorder %s289_s2, %s215_s11  ;;  %p219_p8 = scmp.lt.u32.totalorder %s215_s11, %s289_s2 }
  0x66   :  { %p221_p9 = pnand %p219_p8, %p216_p7 }
  0x68   :  { %224 = shalt.err (!%p221_p9)
}
  0x69   :  { %137 = dma.vmem_to_hbm [thread:$0]  %s135_s6, 16, %s289_s2, [#allocation5]  }
  0x6a   :  { %229 = dma.done.wait [#allocation5], 16  }
  0x6b   :  { %230 = vsyncadd [#allocation5], 4294967280 }
  0x6c   :  { %141 = vsyncpa [#allocation4], 1 }
  0x6d   :  { %142 = vsyncpa [#allocation7], 1 }
  0x6e   :  { %143 = vsyncpa [#allocation5], 1 }

</bundles_post_ra>
